<compile_context>
chip_gen: v6e
topology: v6e:2x2x1
jax: 0.10.0
libtpu: 0.0.40
codegen_flags: <defaults>
</compile_context>

<pallas_src>
import functools
from math import sqrt

import jax
import jax.numpy as jnp
from jax.experimental import pallas as pl
from jax.experimental.pallas import tpu as pltpu


def _round_up(x, m):
    return (x + m - 1) // m * m


def _cdiv(a, b):
    return -(-a // b)


def _vmem_limit_bytes():
    cap = 64 * 1024 * 1024              # v7x physical VMEM (smallest per-TC)
    try:
        info = pltpu.get_tpu_info()
        cap = int(getattr(info, "vmem_capacity_bytes", cap))
    except Exception:
        pass
    return int(min(cap * 3 // 4, 96 * 1024 * 1024))


# ----------------------------------------------------------------------------
# Kernel 1: fused im2col conv (stride == 1).  The kh*kw taps are merged into
# the contraction dim: one (C_out_p, K) @ (K, tile_l) dot per grid step.
# ----------------------------------------------------------------------------
def _fused_conv_kernel(*refs, offsets, tile_l, has_bias, has_tail):
    if has_bias:
        w_ref, b_ref = refs[0], refs[1]
        rest = refs[2:]
    else:
        w_ref, b_ref = refs[0], None
        rest = refs[1:]
    if has_tail:
        xm_ref, xt_ref, o_ref = rest
        # (c_pad, tile_l + TAIL): main tile + small tail of the next tile.
        window = jnp.concatenate([xm_ref[...], xt_ref[...]], axis=1)
    else:
        xm_ref, o_ref = rest
        window = xm_ref[...]

    # Tap-merged im2col slab built entirely in VMEM: (kh*kw*c_pad, tile_l).
    slab = jnp.concatenate([window[:, off:off + tile_l] for off in offsets],
                           axis=0)
    acc = jnp.dot(w_ref[...], slab, preferred_element_type=jnp.float32)
    if has_bias:
        acc = acc + b_ref[...]
    o_ref[...] = acc.astype(o_ref.dtype)


# ----------------------------------------------------------------------------
# Kernel 2: general path — K-tiled  W2d @ unfolded_tile (+ bias), f32 acc.
# ----------------------------------------------------------------------------
def _matmul_bias_kernel(*refs, has_bias):
    if has_bias:
        w_ref, b_ref, x_ref, o_ref, acc_ref = refs
    else:
        w_ref, x_ref, o_ref, acc_ref = refs
        b_ref = None

    @pl.when(pl.program_id(2) == 0)
    def _():
        acc_ref[...] = jnp.zeros_like(acc_ref)

    acc_ref[...] += jnp.dot(w_ref[...], x_ref[...],
                            preferred_element_type=jnp.float32)

    @pl.when(pl.program_id(2) == pl.num_programs(2) - 1)
    def _():
        res = acc_ref[...]
        if has_bias:
            res = res + b_ref[...]
        o_ref[...] = res.astype(o_ref.dtype)


# ----------------------------------------------------------------------------
# im2col (torch.nn.functional.unfold semantics) — only for stride != 1
# ----------------------------------------------------------------------------
def _unfold(x, kernel_size, stride, padding, dilation):
    B, C, H, W = x.shape
    kh, kw = kernel_size
    sh, sw = stride
    ph, pw = padding
    dh, dw = dilation
    hout = (H + 2 * ph - dh * (kh - 1) - 1) // sh + 1
    wout = (W + 2 * pw - dw * (kw - 1) - 1) // sw + 1
    xp = jnp.pad(x, ((0, 0), (0, 0), (ph, ph), (pw, pw)))
    cols = []
    for i in range(kh):
        for j in range(kw):
            patch = xp[
                :, :,
                i * dh: i * dh + sh * (hout - 1) + 1: sh,
                j * dw: j * dw + sw * (wout - 1) + 1: sw,
            ]  # (B, C, hout, wout)
            cols.append(patch)
    col = jnp.stack(cols, axis=2)                     # (B, C, kh*kw, hout, wout)
    col = col.reshape(B, C * kh * kw, hout * wout)    # torch flattening (C,kh,kw)
    return col, hout, wout


# ----------------------------------------------------------------------------
# Forward paths
# ----------------------------------------------------------------------------
def _conv2d_fused_stride1(x, weight, bias, kernel_size, padding, dilation,
                          compute_dtype):
    B, C, H, W = x.shape
    kh, kw = kernel_size
    ph, pw = padding
    dh, dw = dilation
    C_out = weight.shape[0]
    out_dtype = x.dtype
    c_item = jnp.dtype(compute_dtype).itemsize
    o_item = jnp.dtype(out_dtype).itemsize

    sub = 16 if c_item == 2 else 8
    c_pad = _round_up(C, sub)
    cout_p = _round_up(C_out, sub)

    Hp = H + 2 * ph
    Wp = W + 2 * pw
    # Lane-align the row pitch for wide rows so row-tap offsets are 128-aligned.
    Wpitch = _round_up(Wp, 128) if Wp >= 512 else Wp
    hout = Hp - dh * (kh - 1)
    wout = Wp - dw * (kw - 1)
    Lout = hout * Wpitch

    T = kh * kw
    K = T * c_pad
    offsets = tuple(i * dh * Wpitch + j * dw for i in range(kh) for j in range(kw))
    over = max(offsets)
    has_tail = over > 0
    TAIL = _round_up(over, 128) if has_tail else 0
    align = TAIL if has_tail else 128

    # ---- VMEM-budgeted lane tile -------------------------------------------
    limit = _vmem_limit_bytes()
    budget = int(limit * 0.6)
    fixed = cout_p * K * c_item + cout_p * 4 + 3 * c_pad * TAIL * c_item
    per_lane = 3 * c_pad * c_item + K * c_item + 3 * cout_p * 4
    tile_cap = (budget - fixed) // per_lane
    tile_cap = max(align, min(tile_cap, 8192) // align * align)
    tile_l = min(tile_cap, _round_up(Lout, align))
    nt = _cdiv(Lout, tile_l)
    if B * nt < 2 and Lout > align:       # keep both v7x TensorCores busy
        tile_l = _round_up(_cdiv(Lout, 2), align)
        nt = _cdiv(Lout, tile_l)
    lout_pad = nt * tile_l
    lin_need = lout_pad + TAIL

    # ---- single fused pad (channels + spatial + lane tail) -------------------
    extra_rows = _cdiv(max(0, lin_need - Hp * Wpitch), Wpitch)
    xq = jnp.pad(
        x.astype(compute_dtype),
        ((0, 0), (0, c_pad - C), (ph, ph + extra_rows), (pw, Wpitch - W - pw)),
    )
    xf = xq.reshape(B, c_pad, (Hp + extra_rows) * Wpitch)

    # Tap-merged weights: (C_out_p, kh*kw*c_pad), tap-major / channel-minor.
    wq = jnp.pad(weight, ((0, cout_p - C_out), (0, c_pad - C), (0, 0), (0, 0)))
    w_merged = jnp.transpose(wq, (0, 2, 3, 1)).reshape(cout_p, K)
    w_merged = w_merged.astype(compute_dtype)

    has_bias = bias is not None
    operands = [w_merged]
    in_specs = [pl.BlockSpec((cout_p, K), lambda b, t: (0, 0))]
    if has_bias:
        b2d = jnp.pad(bias, (0, cout_p - C_out)).reshape(cout_p, 1)
        operands.append(b2d.astype(jnp.float32))
        in_specs.append(pl.BlockSpec((cout_p, 1), lambda b, t: (0, 0)))
    operands.append(xf)
    in_specs.append(pl.BlockSpec((None, c_pad, tile_l), lambda b, t: (b, 0, t)))
    if has_tail:
        ratio = tile_l // TAIL
        operands.append(xf)   # same array; only a TAIL-wide window of tile t+1
        in_specs.append(pl.BlockSpec((None, c_pad, TAIL),
                                     lambda b, t, _r=ratio: (b, 0, (t + 1) * _r)))

    kernel = functools.partial(_fused_conv_kernel, offsets=offsets,
                               tile_l=tile_l, has_bias=has_bias,
                               has_tail=has_tail)

    flops = 2 * B * cout_p * K * lout_pad
    bytes_accessed = (B * c_pad * (lout_pad + nt * TAIL) * c_item
                      + cout_p * K * c_item + B * cout_p * lout_pad * o_item)

    out = pl.pallas_call(
        kernel,
        out_shape=jax.ShapeDtypeStruct((B, cout_p, lout_pad), out_dtype),
        grid_spec=pltpu.PrefetchScalarGridSpec(
            num_scalar_prefetch=0,
            grid=(B, nt),
            in_specs=in_specs,
            out_specs=pl.BlockSpec((None, cout_p, tile_l), lambda b, t: (b, 0, t)),
        ),
        compiler_params=pltpu.CompilerParams(
            dimension_semantics=("parallel", "parallel"),
            vmem_limit_bytes=limit),
        cost_estimate=pl.CostEstimate(flops=int(flops), transcendentals=0,
                                      bytes_accessed=int(bytes_accessed)),
    )(*operands)

    # Crop channel/lane padding and the (Wpitch-wout) garbage columns.
    out = out[:, :C_out, :Lout].reshape(B, C_out, hout, Wpitch)[:, :, :, :wout]
    return out


def _conv2d_unfold_matmul(x, weight, bias, kernel_size, stride, padding,
                          dilation, compute_dtype):
    """General stride: bf16 unfold + K-tiled matmul kernel with f32 acc."""
    # TODO(synk): for dilation==1 the stride could be folded into sh*sw
    # stride-1 phases reusing the fused kernel (removes the kh*kw unfold
    # HBM blowup); kept as the general fallback here.
    B, C, H, W = x.shape
    kh, kw = kernel_size
    C_out = weight.shape[0]
    out_dtype = x.dtype
    c_item = jnp.dtype(compute_dtype).itemsize
    sub = 16 if c_item == 2 else 8
    cout_p = _round_up(C_out, sub)

    unfolded, hout, wout = _unfold(x.astype(compute_dtype), kernel_size,
                                   stride, padding, dilation)
    K = C * kh * kw
    L = hout * wout

    if K <= 1024:
        tile_k = _round_up(K, sub)
        ntk = 1
    else:
        tile_k = 512
        ntk = _cdiv(K, tile_k)
    K_pad = ntk * tile_k

    limit = _vmem_limit_bytes()
    budget = int(limit * 0.6)
    fixed = 3 * cout_p * tile_k * c_item + cout_p * 4
    per_lane = 3 * tile_k * c_item + 3 * cout_p * 4
    tile_cap = (budget - fixed) // per_lane
    tile_cap = max(128, min(tile_cap, 8192) // 128 * 128)
    tile_l = min(tile_cap, _round_up(L, 128))
    ntl = _cdiv(L, tile_l)
    if B * ntl < 2 and L > 128:
        tile_l = _round_up(_cdiv(L, 2), 128)
        ntl = _cdiv(L, tile_l)
    L_pad = ntl * tile_l

    unfolded = jnp.pad(unfolded, ((0, 0), (0, K_pad - K), (0, L_pad - L)))
    w2d = jnp.pad(weight.reshape(C_out, K),
                  ((0, cout_p - C_out), (0, K_pad - K))).astype(compute_dtype)

    has_bias = bias is not None
    operands = [w2d]
    in_specs = [pl.BlockSpec((cout_p, tile_k), lambda b, t, k: (0, k))]
    if has_bias:
        b2d = jnp.pad(bias, (0, cout_p - C_out)).reshape(cout_p, 1)
        operands.append(b2d.astype(jnp.float32))
        in_specs.append(pl.BlockSpec((cout_p, 1), lambda b, t, k: (0, 0)))
    operands.append(unfolded)
    in_specs.append(pl.BlockSpec((None, tile_k, tile_l), lambda b, t, k: (b, k, t)))

    kernel = functools.partial(_matmul_bias_kernel, has_bias=has_bias)

    flops = 2 * B * cout_p * K_pad * L_pad
    bytes_accessed = (unfolded.size * c_item + w2d.size * c_item
                      + B * cout_p * L_pad * jnp.dtype(out_dtype).itemsize)

    out = pl.pallas_call(
        kernel,
        out_shape=jax.ShapeDtypeStruct((B, cout_p, L_pad), out_dtype),
        grid_spec=pltpu.PrefetchScalarGridSpec(
            num_scalar_prefetch=0,
            grid=(B, ntl, ntk),
            in_specs=in_specs,
            out_specs=pl.BlockSpec((None, cout_p, tile_l),
                                   lambda b, t, k: (b, 0, t)),
            scratch_shapes=[pltpu.VMEM((cout_p, tile_l), jnp.float32)],
        ),
        compiler_params=pltpu.CompilerParams(
            dimension_semantics=("parallel", "parallel", "arbitrary"),
            vmem_limit_bytes=limit),
        cost_estimate=pl.CostEstimate(flops=int(flops), transcendentals=0,
                                      bytes_accessed=int(bytes_accessed)),
    )(*operands)

    return out[:, :C_out, :L].reshape(B, C_out, hout, wout)


@functools.partial(jax.jit, static_argnames=("kernel_size", "stride", "padding",
                                             "dilation", "compute_dtype"))
def _conv2d_forward(x, weight, bias, *, kernel_size, stride, padding, dilation,
                    compute_dtype):
    if stride == (1, 1):
        return _conv2d_fused_stride1(x, weight, bias, kernel_size, padding,
                                     dilation, compute_dtype)
    return _conv2d_unfold_matmul(x, weight, bias, kernel_size, stride, padding,
                                 dilation, compute_dtype)


# ----------------------------------------------------------------------------
# Conv2d module replica
# ----------------------------------------------------------------------------
class Conv2dPallas:
    def __init__(self, in_channels, out_channels, kernel_size, stride=1,
                 padding=0, dilation=1, bias=True, initOption='Pytorch',
                 compute_dtype=jnp.bfloat16, key=None):
        as_pair = lambda v: (v, v) if isinstance(v, int) else tuple(v)
        self.in_channels = in_channels
        self.out_channels = out_channels
        self.kernel_size = as_pair(kernel_size)
        self.stride = as_pair(stride)
        self.padding = as_pair(padding)
        self.dilation = as_pair(dilation)
        self.compute_dtype = compute_dtype

        if key is None:
            key = jax.random.PRNGKey(0)
        kw_, kb_ = jax.random.split(key)
        wshape = (out_channels, in_channels,
                  self.kernel_size[0], self.kernel_size[1])
        if initOption == 'Zero':
            self.weight = jnp.zeros(wshape, jnp.float32)
            self.bias = jnp.zeros((out_channels,), jnp.float32) if bias else None
        elif initOption == 'Normal':
            self.weight = jax.random.normal(kw_, wshape, jnp.float32)
            self.bias = (jax.random.normal(kb_, (out_channels,), jnp.float32)
                         if bias else None)
        else:  # 'Pytorch'
            k = 1.0 / float(in_channels * self.kernel_size[0] * self.kernel_size[1])
            bound = sqrt(k)
            self.weight = jax.random.uniform(kw_, wshape, jnp.float32,
                                             minval=-bound, maxval=bound)
            self.bias = (jax.random.uniform(kb_, (out_channels,), jnp.float32,
                                            minval=-bound, maxval=bound)
                         if bias else None)
        self.gradweight = jnp.zeros_like(self.weight)
        self.gradbias = (jnp.zeros_like(self.bias)
                         if self.bias is not None else None)

    def forward(self, image):
        assert image.shape[1] == self.in_channels
        return _conv2d_forward(
            image, self.weight, self.bias,
            kernel_size=self.kernel_size, stride=self.stride,
            padding=self.padding, dilation=self.dilation,
            compute_dtype=self.compute_dtype)

    __call__ = forward

    # TODO(synk): backward pass (fold / weight-grad accumulation) not
    # implemented; only the forward conv is required here.

    def param(self):
        if self.bias is not None:
            return [(self.weight, self.gradweight), (self.bias, self.gradbias)]
        return [(self.weight, self.gradweight)]

    def zero_grad(self):
        self.gradweight = jnp.zeros_like(self.weight)
        if self.bias is not None:
            self.gradbias = jnp.zeros_like(self.bias)


# ----------------------------------------------------------------------------
# Reference (pure JAX) — same bf16 inputs / f32 accumulation as the kernels
# ----------------------------------------------------------------------------
def _reference_conv(module, x):
    cd = module.compute_dtype
    unfolded, hout, wout = _unfold(x.astype(cd), module.kernel_size,
                                   module.stride, module.padding,
                                   module.dilation)
    w2d = module.weight.reshape(module.out_channels, -1).astype(cd)
    out = jnp.einsum("ok,bkl->bol", w2d, unfolded,
                     preferred_element_type=jnp.float32)
    if module.bias is not None:
        out = out + module.bias.reshape(1, -1, 1)
    return out.astype(x.dtype).reshape(x.shape[0], module.out_channels,
                                       hout, wout)


if __name__ == "__main__":
    key = jax.random.PRNGKey(0)
    k_x, k_p1, k_p2, k_p3 = jax.random.split(key, 4)

    B, C_in, H, W = 2, 4, 16, 16
    C_out = 8
    x = jax.random.normal(k_x, (B, C_in, H, W), jnp.float32)

    # 1) stride-1 fused hot path: 3x3, padding 1, dilation 1, bias.
    conv1 = Conv2dPallas(C_in, C_out, 3, stride=1, padding=1, dilation=1,
                         bias=True, key=k_p1)
    out1 = jax.block_until_ready(conv1(x))
    ref1 = _reference_conv(conv1, x)
    assert out1.shape == (B, C_out, 16, 16), out1.shape
    assert jnp.allclose(out1, ref1, atol=2e-2, rtol=2e-2), "fused 3x3 mismatch"

    # 2) 1x1 conv (fused path without the tail window).
    conv2 = Conv2dPallas(C_in, C_out, 1, stride=1, padding=0, bias=True,
                         key=k_p2)
    out2 = jax.block_until_ready(conv2(x))
    ref2 = _reference_conv(conv2, x)
    assert out2.shape == (B, C_out, 16, 16), out2.shape
    assert jnp.allclose(out2, ref2, atol=2e-2, rtol=2e-2), "fused 1x1 mismatch"

    # 3) strided path (unfold + K-tiled matmul kernel), no bias.
    conv3 = Conv2dPallas(C_in, C_out, 3, stride=2, padding=1, bias=False,
                         key=k_p3)
    out3 = jax.block_until_ready(conv3(x))
    ref3 = _reference_conv(conv3, x)
    assert out3.shape == (B, C_out, 8, 8), out3.shape
    assert jnp.allclose(out3, ref3, atol=2e-2, rtol=2e-2), "strided mismatch"

    print("KERNEL_OK")
</pallas_src>

<mosaic_0001>
module attributes {stable_mosaic.version = 11 : i64} {
  func.func @_fused_conv_kernel(%arg0: i32, %arg1: i32, %arg2: memref<16x144xbf16, #tpu.memory_space<vmem>>, %arg3: memref<16x1xf32, #tpu.memory_space<vmem>>, %arg4: memref<1x16x384xbf16, #tpu.memory_space<vmem>>, %arg5: memref<1x16x128xbf16, #tpu.memory_space<vmem>>, %arg6: memref<1x16x384xf32, #tpu.memory_space<vmem>>) attributes {dimension_semantics = [#tpu.dimension_semantics<parallel>, #tpu.dimension_semantics<parallel>], iteration_bounds = array<i64: 2, 1>, scalar_prefetch = 0 : i64, scratch_operands = 0 : i64, tpu.core_type = #tpu.core_type<tc>, window_params = [{pipeline_mode = #tpu.pipeline_mode<synchronous>, transform_indices = @transform_0, window_bounds = array<i64: 16, 144>}, {pipeline_mode = #tpu.pipeline_mode<synchronous>, transform_indices = @transform_1, window_bounds = array<i64: 16, 1>}, {transform_indices = @transform_2, window_bounds = array<i64: 1, 16, 384>}, {transform_indices = @transform_3, window_bounds = array<i64: 1, 16, 128>}, {transform_indices = @transform_4, window_bounds = array<i64: 1, 16, 384>}]} {
    %c0 = arith.constant 0 : index
    %c0_0 = arith.constant 0 : index
    %c0_1 = arith.constant 0 : index
    %0 = vector.load %arg4[%c0, %c0_0, %c0_1] : memref<1x16x384xbf16, #tpu.memory_space<vmem>>, vector<1x16x384xbf16>
    %1 = vector.shape_cast %0 : vector<1x16x384xbf16> to vector<16x384xbf16>
    %c0_2 = arith.constant 0 : index
    %c0_3 = arith.constant 0 : index
    %c0_4 = arith.constant 0 : index
    %2 = vector.load %arg5[%c0_2, %c0_3, %c0_4] : memref<1x16x128xbf16, #tpu.memory_space<vmem>>, vector<1x16x128xbf16>
    %3 = vector.shape_cast %2 : vector<1x16x128xbf16> to vector<16x128xbf16>
    %4 = tpu.concatenate %1, %3 in 1 : vector<16x384xbf16>, vector<16x128xbf16> -> vector<16x512xbf16>
    %5 = vector.extract_strided_slice %4 {offsets = [0, 0], sizes = [16, 384], strides = [1, 1]} : vector<16x512xbf16> to vector<16x384xbf16>
    %6 = vector.extract_strided_slice %4 {offsets = [0, 1], sizes = [16, 384], strides = [1, 1]} : vector<16x512xbf16> to vector<16x384xbf16>
    %7 = vector.extract_strided_slice %4 {offsets = [0, 2], sizes = [16, 384], strides = [1, 1]} : vector<16x512xbf16> to vector<16x384xbf16>
    %8 = vector.extract_strided_slice %4 {offsets = [0, 18], sizes = [16, 384], strides = [1, 1]} : vector<16x512xbf16> to vector<16x384xbf16>
    %9 = vector.extract_strided_slice %4 {offsets = [0, 19], sizes = [16, 384], strides = [1, 1]} : vector<16x512xbf16> to vector<16x384xbf16>
    %10 = vector.extract_strided_slice %4 {offsets = [0, 20], sizes = [16, 384], strides = [1, 1]} : vector<16x512xbf16> to vector<16x384xbf16>
    %11 = vector.extract_strided_slice %4 {offsets = [0, 36], sizes = [16, 384], strides = [1, 1]} : vector<16x512xbf16> to vector<16x384xbf16>
    %12 = vector.extract_strided_slice %4 {offsets = [0, 37], sizes = [16, 384], strides = [1, 1]} : vector<16x512xbf16> to vector<16x384xbf16>
    %13 = vector.extract_strided_slice %4 {offsets = [0, 38], sizes = [16, 384], strides = [1, 1]} : vector<16x512xbf16> to vector<16x384xbf16>
    %14 = tpu.concatenate %5, %6, %7, %8, %9, %10, %11, %12, %13 in 0 : vector<16x384xbf16>, vector<16x384xbf16>, vector<16x384xbf16>, vector<16x384xbf16>, vector<16x384xbf16>, vector<16x384xbf16>, vector<16x384xbf16>, vector<16x384xbf16>, vector<16x384xbf16> -> vector<144x384xbf16>
    %c0_5 = arith.constant 0 : index
    %c0_6 = arith.constant 0 : index
    %15 = vector.load %arg2[%c0_5, %c0_6] : memref<16x144xbf16, #tpu.memory_space<vmem>>, vector<16x144xbf16>
    %cst = arith.constant dense<0.000000e+00> : vector<16x384xf32>
    %16 = tpu.matmul %15, %14, %cst {dimension_numbers = #tpu.dot_dimension_numbers<[1], [0], [0], [1], [0, 0, 1, 1], [], []>} : vector<16x144xbf16>, vector<144x384xbf16>, vector<16x384xf32> -> vector<16x384xf32>
    %c0_7 = arith.constant 0 : index
    %c0_8 = arith.constant 0 : index
    %17 = vector.load %arg3[%c0_7, %c0_8] : memref<16x1xf32, #tpu.memory_space<vmem>>, vector<16x1xf32>
    %18 = vector.broadcast %17 : vector<16x1xf32> to vector<16x384xf32>
    %19 = arith.addf %16, %18 : vector<16x384xf32>
    %c0_9 = arith.constant 0 : index
    %c0_10 = arith.constant 0 : index
    %c0_11 = arith.constant 0 : index
    %20 = vector.load %arg6[%c0_9, %c0_10, %c0_11] : memref<1x16x384xf32, #tpu.memory_space<vmem>>, vector<1x16x384xf32>
    %21 = vector.shape_cast %20 : vector<1x16x384xf32> to vector<16x384xf32>
    %22 = vector.shape_cast %19 : vector<16x384xf32> to vector<1x16x384xf32>
    tpu.vector_store %arg6[%c0_9, %c0_10, %c0_11], %22 {strides = array<i32>} : memref<1x16x384xf32, #tpu.memory_space<vmem>>, vector<1x16x384xf32>,
    return
  }
  func.func @transform_0(%arg0: i32, %arg1: i32) -> (i32, i32) {
    %c0_i32 = arith.constant 0 : i32
    %c0_i32_0 = arith.constant 0 : i32
    %c0_i32_1 = arith.constant 0 : i32
    return %c0_i32, %c0_i32_0 : i32, i32
  }
  func.func @transform_1(%arg0: i32, %arg1: i32) -> (i32, i32) {
    %c0_i32 = arith.constant 0 : i32
    %c0_i32_0 = arith.constant 0 : i32
    %c0_i32_1 = arith.constant 0 : i32
    return %c0_i32, %c0_i32_0 : i32, i32
  }
  func.func @transform_2(%arg0: i32, %arg1: i32) -> (i32, i32, i32) {
    %c0_i32 = arith.constant 0 : i32
    %c0_i32_0 = arith.constant 0 : i32
    return %arg0, %c0_i32, %arg1 : i32, i32, i32
  }
  func.func @transform_3(%arg0: i32, %arg1: i32) -> (i32, i32, i32) {
    %c1_i32 = arith.constant 1 : i32
    %0 = arith.addi %arg1, %c1_i32 : i32
    %c3_i32 = arith.constant 3 : i32
    %1 = arith.muli %0, %c3_i32 : i32
    %c0_i32 = arith.constant 0 : i32
    %c0_i32_0 = arith.constant 0 : i32
    return %arg0, %c0_i32, %1 : i32, i32, i32
  }
  func.func @transform_4(%arg0: i32, %arg1: i32) -> (i32, i32, i32) {
    %c0_i32 = arith.constant 0 : i32
    %c0_i32_0 = arith.constant 0 : i32
    return %arg0, %c0_i32, %arg1 : i32, i32, i32
  }
}

</mosaic_0001>

<bundles_post_ra>
// kernel: _conv2d_forward.1
= control target key start
LH: loop header
LB: loop body
LE: loop exit
PB: predicated region body
PF: predicated region fallthrough
CT: control target
= control target key end

     0   :  { %s1410_s15 = smov 0   ;;  %s1412_s16 = smov 0   ;;  %s1545_s0 = inlined_call_operand.vmem [shape: bf16[16,144], index: 0, kind: input, shape index: {}]   ;;  %s1546_s1 = inlined_call_operand.vmem [shape: f32[16,1], index: 1, kind: input, shape index: {}]   ;;  %s1547_s2 = inlined_call_operand.vmem [shape: bf16[2,16,522], index: 2, kind: input, shape index: {}, may-alias: {2,3}]   ;;  %s1548_s3 = inlined_call_operand.vmem [shape: bf16[2,16,522], index: 3, kind: input, shape index: {}, may-alias: {2,3}]   ;;  %s1549_s4 = inlined_call_operand.vmem [shape: f32[2,16,384], index: 4, kind: output, shape index: {}]  }
   0x1   :  { %s1414_s17 = smov 0   ;;  %s1416_s18 = smov 0  }
   0x2   :  { %s1418_s19 = smov 0  }
   0x3 LB: > { %s26_s20 = sadd.s32 1, %s1366_s18  ;;  %p84_p1 = scmp.ne.s32.totalorder %s1358_s16, %s1354_s15  ;;  %s1370_s19 = sphi %s1418_s19, %s14_s19   ;;  %s1366_s18 = sphi %s1416_s18, %s1554_s18   ;;  %s1362_s17 = sphi %s1414_s17, %s1553_s17   ;;  %s1358_s16 = sphi %s1412_s16, %s1552_s16   ;;  %s1354_s15 = sphi %s1410_s15, %s1551_s15  }
   0x4   : > { %p28_p0 = scmp.ge.s32.totalorder %s26_s20, 2  ;;  %p85_p2 = scmp.eq.s32.totalorder %s1370_s19, 0 }
   0x5   : > { %s77_s23 = sadd.s32 1, %s1358_s16  ;;  %p1190_p5 = scmp.ge.s32.totalorder %s1370_s19, 2 }
   0x6   : > { %s1556_s20 = smov (%p28_p0, %s26_s20), 0  ;;  %p1441_p3 = por %p85_p2, %p84_p1 }
   0x7   : > { %s72_s22 = ssub.s32 %s1366_s18, %s1556_s20  ;;  %176 = sbr.rel (%p1190_p5) target bundleno = 31 (0x1f), region = 24 }
   0x8   : > { %p75_p4 = scmp.eq.s32.totalorder %s72_s22, 0 }
   0xa   : > { %s1449_s24 = scalar_select %p75_p4, %s1358_s16, %s77_s23  }
   0xc   : > { %179 = sbr.rel (!%p1441_p3) target bundleno = 25 (0x19), region = 28  ;;  %s181_s25 = sand.u32 (%p1441_p3), 1, %s1358_s16  }
   0xd   : > { %s1222_s26 = smul.u32 (%p1441_p3), 40, %s1366_s18  ;;  %s1372_s6 = smov (%p1441_p3), 0  }
   0xe   : > { %s1221_s27 = smul.u32 (%p1441_p3), 24, %s181_s25 }
   0xf   : > { %s193_s30 = scalar_lea.vmem (%p1441_p3), %s1547_s2, %s1222_s26  }
  0x10   : > { %s183_s5 = scalar_lea.vmem (%p1441_p3), [#allocation2], %s1221_s27  }
  0x11 LB: >> { %v579_v0 = vld [vmem:[%s193_s30] sm:$0xff]  ;;  %v581_v1 = vld [vmem:[%s193_s30 + $0x14] sm:$0xff]  ;;  %s573_s6 = sadd.s32 1, %s1374_s6   ;;  %s1374_s6 = sphi %s1372_s6, %s573_s6  }
  0x12   : >> { %580 = vst [vmem:[%s183_s5] sm:$0xff] %v579_v0  ;;  %582 = vst [vmem:[%s183_s5 + $0xc] sm:$0xff] %v581_v1  ;;  %p572_p6 = scmp.ge.s32.totalorder %s573_s6, 1 }
  0x13   : > { %v1200_v2 = vld [vmem:[%s193_s30 + $0x8] sm:$0xf] (%p572_p6)  ;;  %v1202_v3 = vld [vmem:[%s193_s30 + $0x1c] sm:$0xf] (%p572_p6) }
  0x14   : > { %575 = sbr.rel (!%p572_p6) target bundleno = 17 (0x11), region = 237  ;;  %1201 = vst [vmem:[%s183_s5 + $0x8] sm:$0xf] (%p572_p6), %v1200_v2  ;;  %1203 = vst [vmem:[%s183_s5 + $0x14] sm:$0xf] (%p572_p6), %v1202_v3 }
  0x19 PF: > { %607 = sbr.rel (!%p1441_p3) target bundleno = 31 (0x1f), region = 94  ;;  %s609_s7 = sand.u32 (%p1441_p3), 1, %s1358_s16  }
  0x1a   : > { %s1205_s8 = smul.u32 (%p1441_p3), 40, %s1366_s18  ;;  %s1204_s9 = sshll.u32 (%p1441_p3), %s609_s7, 3 }
  0x1b   : > { %s611_s13 = scalar_lea.vmem (%p1441_p3), [#allocation3], %s1204_s9 }
  0x1c   : > { %s1058_s12 = scalar_lea.vmem (%p1441_p3), %s1548_s3, %s1205_s8 }
  0x1d   : > { %v1206_v4 = vld [vmem:[%s1058_s12 + $0xc] sm:$0xf] (%p1441_p3)  ;;  %v1207_v5 = vld [vmem:[%s1058_s12 + $0x20] sm:$0xf] (%p1441_p3) }
  0x1e   : > { %635 = vst [vmem:[%s611_s13] sm:$0xf] %v1206_v4  ;;  %637 = vst [vmem:[%s611_s13 + $0x4] sm:$0xf] %v1207_v5 }
  0x1f PF: > { %p1208_p7 = scmp.ge.s32.totalorder %s1370_s19, 1  ;;  %p664_p8 = scmp.lt.s32.totalorder %s1370_s19, 3 }
  0x21   : > { %p665_p9 = pnand %p1208_p7, %p664_p8 }
  0x22   : > { %s671_s14 = sand.u32 (!%p665_p9), 1, %s1354_s15   ;;  %s1377_s26 = smov (!%p665_p9), 91  }
  0x23   : > { %668 = sbr.rel (%p665_p9) target bundleno = 423 (0x1a7), region = 135  ;;  %s1209_s21 = sshll.u32 (!%p665_p9), %s671_s14, 3 }
  0x24   : > { %s1223_s22 = smul.u32 (!%p665_p9), 24, %s671_s14  ;;  %s680_s23 = scalar_lea.vmem (!%p665_p9), [#allocation3], %s1209_s21 }
  0x25   : > { %s1378_s15 = smov (!%p665_p9), 92   ;;  %s1379_s27 = smov (!%p665_p9), 108  }
  0x26   : > { %s673_s25 = scalar_lea.vmem (!%p665_p9), [#allocation2], %s1223_s22  ;;  %s1380_s28 = smov (!%p665_p9), 109  }
  0x27   : > { %s1381_s29 = smov (!%p665_p9), 110   ;;  %s1382_s30 = smov (!%p665_p9), 126  }
  0x28   : > { %v1376_v6 = vmov 0   ;;  %v1308_v7 = vld [vmem:[%s680_s23] sm:$0xff]   ;;  %s1383_s5 = smov 127   ;;  %v1315_v11 = vld [vmem:[%s1545_s0 + $0x4] ss:$8 sps:$4 sm:$0xff]   ;;  %vm899_vm0 = vcmask 130048  }
  0x29   : > { %946 = vmatprep.subr.bf16.mxu1 %v1376_v6  ;;  %1306 = vset.pattern.permute.xlu0 %v1376_v6  ;;  %v1472_v8 = vld [vmem:[%s673_s25 + $0x4] ss:$12 sps:$4 sm:$0xff]   ;;  %v1474_v9 = vld [vmem:[%s673_s25] ss:$12 sps:$4 sm:$0xff]   ;;  %v1477_v10 = vld [vmem:[%s673_s25 + $0x8] ss:$12 sps:$4 sm:$0xff]  }
  0x2a   : > { %1307 = vset.pattern.permute.xlu1 %v1376_v6  ;;  %848 = vrot.lane.b32.xlu0 %v1472_v8, %s1377_s26  ;;  %s1384_s8 = smov 90   ;;  %v879_v12 = vld [vmem:[%s1546_s1 + $0x8] sm:$0xff]  ;;  %v878_v13 = vld [vmem:[%s1546_s1] sm:$0xff]  ;;  %vm854_vm1 = vcmask 744448   ;;  %vm839_vm2 = vcmask 752640   ;;  %vm824_vm3 = vcmask 883712  }
  0x2b   : > { %852 = vrot.lane.b32.xlu1 %v1308_v7, %s1377_s26  ;;  %1218 = vmatprep.mubr.msk.bf16.mxu1 %vm899_vm0, %v1315_v11  ;;  %vm809_vm4 = vcmask 891904   ;;  %vm794_vm5 = vcmask 900096   ;;  %vm779_vm6 = vcmask 1031168   ;;  %vm764_vm7 = vcmask 1039360   ;;  %v1313_v4 = vld [vmem:[%s1545_s0] ss:$8 sps:$4 sm:$0xff]  }
  0x2c   : > { %1217 = vmatprep.mubr.msk.bf16.mxu0 %vm899_vm0, %v1315_v11  ;;  %vm869_vm8 = vcmask 736256   ;;  %p719_p10 = scmp.lt.s32.totalorder %s1362_s17, 1 }
  0x2e   : > { %850 = vrot.lane.b32.xlu0 %v1477_v10, %s1377_s26  ;;  %s1558_s17 = smov (!%p719_p10, %s1362_s17), 1 }
  0x2f   : > { %846 = vrot.lane.b32.xlu1 %v1474_v9, %s1377_s26  ;;  %s1224_s21 = smul.u32 48, %s1558_s17 }
  0x31   : > { %s726_s25 = scalar_lea.vmem %s1549_s4, %s1224_s21 }
  0x32   : > { %833 = vrot.lane.b32.xlu0 %v1472_v8, %s1378_s15 }
  0x33   : > { %835 = vrot.lane.b32.xlu1 %v1477_v10, %s1378_s15 }
  0x36   : > { %831 = vrot.lane.b32.xlu0 %v1474_v9, %s1378_s15 }
  0x37   : > { %837 = vrot.lane.b32.xlu1 %v1308_v7, %s1378_s15 }
  0x3a   : > { %818 = vrot.lane.b32.xlu0 %v1472_v8, %s1379_s27 }
  0x3b   : > { %820 = vrot.lane.b32.xlu1 %v1477_v10, %s1379_s27 }
  0x3e   : > { %816 = vrot.lane.b32.xlu0 %v1474_v9, %s1379_s27 }
  0x3f   : > { %822 = vrot.lane.b32.xlu1 %v1308_v7, %s1379_s27 }
  0x42   : > { %803 = vrot.lane.b32.xlu0 %v1472_v8, %s1380_s28 }
  0x43   : > { %805 = vrot.lane.b32.xlu1 %v1477_v10, %s1380_s28 }
  0x46   : > { %801 = vrot.lane.b32.xlu0 %v1474_v9, %s1380_s28 }
  0x47   : > { %807 = vrot.lane.b32.xlu1 %v1308_v7, %s1380_s28 }
  0x4a   : > { %788 = vrot.lane.b32.xlu0 %v1472_v8, %s1381_s29 }
  0x4b   : > { %790 = vrot.lane.b32.xlu1 %v1477_v10, %s1381_s29 }
  0x4e   : > { %786 = vrot.lane.b32.xlu0 %v1474_v9, %s1381_s29 }
  0x4f   : > { %792 = vrot.lane.b32.xlu1 %v1308_v7, %s1381_s29 }
  0x52   : > { %773 = vrot.lane.b32.xlu0 %v1472_v8, %s1382_s30 }
  0x53   : > { %775 = vrot.lane.b32.xlu1 %v1477_v10, %s1382_s30 }
  0x56   : > { %771 = vrot.lane.b32.xlu0 %v1474_v9, %s1382_s30 }
  0x57   : > { %777 = vrot.lane.b32.xlu1 %v1308_v7, %s1382_s30 }
  0x5a   : > { %758 = vrot.lane.b32.xlu0 %v1472_v8, %s1383_s5 }
  0x5b   : > { %760 = vrot.lane.b32.xlu1 %v1477_v10, %s1383_s5 }
  0x5e   : > { %756 = vrot.lane.b32.xlu0 %v1474_v9, %s1383_s5 }
  0x5f   : > { %762 = vrot.lane.b32.xlu1 %v1308_v7, %s1383_s5 }
  0x62   : > { %863 = vrot.lane.b32.xlu0 %v1472_v8, %s1384_s8 }
  0x63   : > { %865 = vrot.lane.b32.xlu1 %v1477_v10, %s1384_s8 }
  0x66   : > { %861 = vrot.lane.b32.xlu0 %v1474_v9, %s1384_s8 }
  0x67   : > { %867 = vrot.lane.b32.xlu1 %v1308_v7, %s1384_s8 }
  0x6a   : > { %882 = vperm.xlu0 %1306, %v878_v13  }
  0x6b   : > { %887 = vperm.xlu1 %1307, %v879_v12  }
  0x9c   : > { %v849_v15 = vpop.permute.xlu0 %848 }
  0x9d   : > { %v853_v14 = vpop.permute.xlu1 %852 }
  0xa0   : > { %v851_v17 = vpop.permute.xlu0 %850 }
  0xa1   : > { %v847_v16 = vpop.permute.xlu1 %846  ;;  %v856_v18 = vsel %vm854_vm1, %v849_v15, %v851_v17  ;;  %v857_v19 = vsel %vm854_vm1, %v851_v17, %v853_v14 }
  0xa2   : > { %903 = vmatprep.subr.bf16.mxu0 %v856_v18  ;;  %947 = vmatpush1.bf16.msra.mxu1 %v857_v19  ;;  %v855_v20 = vsel %vm854_vm1, %v847_v16, %v849_v15 }
  0xa3   : > { %904 = vmatpush1.bf16.msra.mxu0 %v855_v20  ;;  %948 = vmatprep.subr.bf16.mxu1 %v1376_v6 }
  0xa4   : > { %v834_v22 = vpop.permute.xlu0 %833 }
  0xa5   : > { %v836_v21 = vpop.permute.xlu1 %835 }
  0xa6   : > { %v841_v23 = vsel %vm839_vm2, %v834_v22, %v836_v21 }
  0xa7   : > { %905 = vmatprep.subr.bf16.mxu0 %v841_v23 }
  0xa8   : > { %v832_v26 = vpop.permute.xlu0 %831 }
  0xa9   : > { %v838_v24 = vpop.permute.xlu1 %837  ;;  %v840_v27 = vsel %vm839_vm2, %v832_v26, %v834_v22 }
  0xaa   : > { %v842_v25 = vsel %vm839_vm2, %v836_v21, %v838_v24  ;;  %906 = vmatpush1.bf16.msra.mxu0 %v840_v27 }
  0xab   : > { %949 = vmatpush1.bf16.msra.mxu1 %v842_v25 }
  0xac   : > { %950 = vmatprep.subr.bf16.mxu1 %v1376_v6  ;;  %v819_v29 = vpop.permute.xlu0 %818 }
  0xad   : > { %v821_v28 = vpop.permute.xlu1 %820 }
  0xae   : > { %v826_v30 = vsel %vm824_vm3, %v819_v29, %v821_v28 }
  0xaf   : > { %907 = vmatprep.subr.bf16.mxu0 %v826_v30 }
  0xb0   : > { %v817_v33 = vpop.permute.xlu0 %816 }
  0xb1   : > { %v823_v31 = vpop.permute.xlu1 %822  ;;  %v825_v34 = vsel %vm824_vm3, %v817_v33, %v819_v29 }
  0xb2   : > { %v827_v32 = vsel %vm824_vm3, %v821_v28, %v823_v31  ;;  %908 = vmatpush1.bf16.msra.mxu0 %v825_v34 }
  0xb3   : > { %951 = vmatpush1.bf16.msra.mxu1 %v827_v32 }
  0xb4   : > { %952 = vmatprep.subr.bf16.mxu1 %v1376_v6  ;;  %v804_v36 = vpop.permute.xlu0 %803 }
  0xb5   : > { %v806_v35 = vpop.permute.xlu1 %805 }
  0xb6   : > { %v811_v37 = vsel %vm809_vm4, %v804_v36, %v806_v35 }
  0xb7   : > { %909 = vmatprep.subr.bf16.mxu0 %v811_v37 }
  0xb8   : > { %v802_v40 = vpop.permute.xlu0 %801 }
  0xb9   : > { %v808_v38 = vpop.permute.xlu1 %807  ;;  %v810_v41 = vsel %vm809_vm4, %v802_v40, %v804_v36 }
  0xba   : > { %v812_v39 = vsel %vm809_vm4, %v806_v35, %v808_v38  ;;  %910 = vmatpush1.bf16.msra.mxu0 %v810_v41 }
  0xbb   : > { %953 = vmatpush1.bf16.msra.mxu1 %v812_v39 }
  0xbc   : > { %954 = vmatprep.subr.bf16.mxu1 %v1376_v6  ;;  %v789_v43 = vpop.permute.xlu0 %788 }
  0xbd   : > { %v791_v42 = vpop.permute.xlu1 %790 }
  0xbe   : > { %v796_v44 = vsel %vm794_vm5, %v789_v43, %v791_v42 }
  0xbf   : > { %911 = vmatprep.subr.bf16.mxu0 %v796_v44 }
  0xc0   : > { %v787_v47 = vpop.permute.xlu0 %786 }
  0xc1   : > { %v793_v45 = vpop.permute.xlu1 %792  ;;  %v795_v48 = vsel %vm794_vm5, %v787_v47, %v789_v43 }
  0xc2   : > { %v797_v46 = vsel %vm794_vm5, %v791_v42, %v793_v45  ;;  %912 = vmatpush1.bf16.msra.mxu0 %v795_v48 }
  0xc3   : > { %955 = vmatpush1.bf16.msra.mxu1 %v797_v46 }
  0xc4   : > { %956 = vmatprep.subr.bf16.mxu1 %v1376_v6  ;;  %v774_v50 = vpop.permute.xlu0 %773 }
  0xc5   : > { %v776_v49 = vpop.permute.xlu1 %775 }
  0xc6   : > { %v781_v51 = vsel %vm779_vm6, %v774_v50, %v776_v49 }
  0xc7   : > { %913 = vmatprep.subr.bf16.mxu0 %v781_v51 }
  0xc8   : > { %v772_v54 = vpop.permute.xlu0 %771 }
  0xc9   : > { %v778_v52 = vpop.permute.xlu1 %777  ;;  %v780_v55 = vsel %vm779_vm6, %v772_v54, %v774_v50 }
  0xca   : > { %v782_v53 = vsel %vm779_vm6, %v776_v49, %v778_v52  ;;  %914 = vmatpush1.bf16.msra.mxu0 %v780_v55 }
  0xcb   : > { %957 = vmatpush1.bf16.msra.mxu1 %v782_v53 }
  0xcc   : > { %958 = vmatprep.subr.bf16.mxu1 %v1376_v6  ;;  %v759_v57 = vpop.permute.xlu0 %758 }
  0xcd   : > { %v761_v56 = vpop.permute.xlu1 %760 }
  0xce   : > { %v766_v58 = vsel %vm764_vm7, %v759_v57, %v761_v56 }
  0xcf   : > { %915 = vmatprep.subr.bf16.mxu0 %v766_v58 }
  0xd0   : > { %v757_v61 = vpop.permute.xlu0 %756 }
  0xd1   : > { %v763_v59 = vpop.permute.xlu1 %762  ;;  %v765_v62 = vsel %vm764_vm7, %v757_v61, %v759_v57 }
  0xd2   : > { %v767_v60 = vsel %vm764_vm7, %v761_v56, %v763_v59  ;;  %916 = vmatpush1.bf16.msra.mxu0 %v765_v62 }
  0xd3   : > { %959 = vmatpush1.bf16.msra.mxu1 %v767_v60  ;;  %917 = vmatprep.subr.bf16.mxu0 %v1472_v8 }
  0xd4   : > { %960 = vmatprep.subr.bf16.mxu1 %v1376_v6  ;;  %v864_v0 = vpop.permute.xlu0 %863 }
  0xd5   : > { %v866_v63 = vpop.permute.xlu1 %865 }
  0xd6   : > { %v871_v1 = vsel %vm869_vm8, %v864_v0, %v866_v63  ;;  %918 = vmatpush1.bf16.msra.mxu0 %v1474_v9 }
  0xd7   : > { %961 = vmatpush1.bf16.msra.mxu1 %v1477_v10  ;;  %933 = vmatprep.subr.bf16.mxu0 %v871_v1 }
  0xd8   : > { %976 = vmatprep.subr.bf16.mxu1 %v1376_v6  ;;  %v862_v5 = vpop.permute.xlu0 %861 }
  0xd9   : > { %v868_v2 = vpop.permute.xlu1 %867  ;;  %v870_v7 = vsel %vm869_vm8, %v862_v5, %v864_v0 }
  0xda   : > { %v872_v3 = vsel %vm869_vm8, %v866_v63, %v868_v2  ;;  %934 = vmatpush2.bf16.msra.mxu0 %v870_v7 }
  0xdb   : > { %977 = vmatpush2.bf16.msra.mxu1 %v872_v3 }
  0xdd   : > { %936 = vmatmul.mubr.bf16.vlgmr.msra.gmra.mxu0 %v1313_v4 }
  0xde   : > { %979 = vmatmul.mubr.bf16.vlgmr.msra.gmra.mxu1 %v1313_v4 }
  0xe5   : > { %v883_v6 = vpop.permute.xlu0 %882 }
  0xe6   : > { %v888_v9 = vpop.permute.xlu1 %887 }
 0x19d   : > { %v937_v11 = vpop.f32.mrf.mxu0 }
 0x19e   : > { %v980_v8 = vpop.f32.mrf.mxu1  ;;  %v938_v13 = vadd.f32 %v937_v11, %v883_v6 }
 0x19f   : > { %v981_v10 = vadd.f32 %v980_v8, %v883_v6  ;;  %v939_v14 = vpop.f32.mrf.mxu0 }
 0x1a0   : > { %v982_v12 = vpop.f32.mrf.mxu1  ;;  %987 = vst [vmem:[%s726_s25] sm:$0xff] %v938_v13  ;;  %v940_v16 = vadd.f32 %v939_v14, %v883_v6 }
 0x1a1   : > { %989 = vst [vmem:[%s726_s25 + $0x10] sm:$0xff] %v981_v10  ;;  %v941_v18 = vpop.f32.mrf.mxu0 }
 0x1a2   : > { %v983_v15 = vpop.f32.mrf.mxu1  ;;  %988 = vst [vmem:[%s726_s25 + $0x8] sm:$0xff] %v940_v16  ;;  %v942_v20 = vadd.f32 %v941_v18, %v888_v9 }
 0x1a3   : > { %v984_v17 = vadd.f32 %v983_v15, %v888_v9  ;;  %v943_v21 = vpop.f32.mrf.mxu0 }
 0x1a4   : > { %v985_v19 = vpop.f32.mrf.mxu1  ;;  %990 = vst [vmem:[%s726_s25 + $0x18] sm:$0xff] %v942_v20  ;;  %v944_v22 = vadd.f32 %v943_v21, %v888_v9 }
 0x1a5   : > { %992 = vst [vmem:[%s726_s25 + $0x28] sm:$0xff] %v984_v17 }
 0x1a6   : > { %991 = vst [vmem:[%s726_s25 + $0x20] sm:$0xff] %v944_v22 }
 0x1a7 PF: > { %s14_s19 = sadd.s32 1, %s1370_s19   ;;  %s1551_s15 = smov %s1358_s16 }
 0x1a8   : > { %p11_p11 = scmp.ge.s32.totalorder %s14_s19, 4   ;;  %s1552_s16 = smov %s1449_s24 }
 0x1a9   : > { %s1553_s17 = smov %s1366_s18  ;;  %s1554_s18 = smov %s1556_s20 }
 0x1aa   :  { %13 = sbr.rel (!%p11_p11) target bundleno = 3 (0x3), region = 248 }

</bundles_post_ra>
